<compile_context>
chip_gen: v7x
topology: tpu7x:2x2x1
jax: 0.10.0
libtpu: 0.0.40
codegen_flags: <defaults>
</compile_context>

<pallas_src>
import jax
import jax.numpy as jnp
from jax.experimental import pallas as pl
from jax.experimental.pallas import tpu as pltpu

F32 = jnp.float32


def _sigmoid(x):
    # single EUP op (tanh) + one VPU FMA, instead of exp+add+divide
    return 0.5 * jnp.tanh(0.5 * x) + 0.5


def _silu(x):
    return x * _sigmoid(x)


def _softplus(x):
    # single-exp, overflow-safe softplus
    return jnp.maximum(x, 0.0) + jnp.log1p(jnp.exp(-jnp.abs(x)))


# ----------------------------------------------------------------------------
# Fused kernel: conv block -> Mamba -> Linear on last timestep
# ----------------------------------------------------------------------------
def omamba_kernel(xw_ref, cw1_ref, cb1_ref, cw2_ref, cb2_ref,
                  winxz_ref, shift_ref, convw_ref, convb_ref,
                  wxdtbc_ref, wdt_ref, bdt_ref,
                  aflat_ref, k_ref, s_ref, dvec_ref, wout_ref,
                  linw_ref, linb_ref,
                  pred_ref,
                  xz_scr, dtbc_scr, dA_scr, dBu_scr):
    L = xw_ref.shape[0]                 # sequence length (= conv spatial H)
    d_inner = convw_ref.shape[1]
    d_conv = convw_ref.shape[0]
    d_state = k_ref.shape[0]
    dt_rank = wdt_ref.shape[0]

    # ---- conv block: 1x1 convs + eval-mode BN folded into block-diag matmuls
    h1 = jnp.dot(xw_ref[...], cw1_ref[...], preferred_element_type=F32) + cb1_ref[...]
    h1 = jnp.maximum(h1, 0.0)
    u = jnp.dot(h1, cw2_ref[...], preferred_element_type=F32) + cb2_ref[...]
    u = jnp.maximum(u, 0.0)             # (L, d_model) == conv(x).squeeze(0)[0]

    # ---- Mamba in_proj: x and z from ONE fused matmul, sliced back via refs
    xz_scr[...] = jnp.dot(u, winxz_ref[...], preferred_element_type=F32)
    x = xz_scr[:, pl.ds(0, d_inner)]            # (L, d_inner)
    z = xz_scr[:, pl.ds(d_inner, d_inner)]      # (L, d_inner)

    # ---- causal depthwise conv1d via precomputed shift matrices (MXU)
    acc = x * convw_ref[pl.ds(d_conv - 1, 1), :]            # zero-shift tap
    for k in range(d_conv - 1):                              # shifts 3, 2, 1
        xs = jnp.dot(shift_ref[k], x, preferred_element_type=F32)
        acc = acc + xs * convw_ref[pl.ds(k, 1), :]
    xc = _silu(acc + convb_ref[...])                         # (L, d_inner)

    # ---- fused x_proj -> (dt_low | B | C)
    dtbc_scr[...] = jnp.dot(xc, wxdtbc_ref[...], preferred_element_type=F32)
    dt_low = dtbc_scr[:, pl.ds(0, dt_rank)]
    B = dtbc_scr[:, pl.ds(dt_rank, d_state)]
    C = dtbc_scr[:, pl.ds(dt_rank + d_state, d_state)]
    delta = _softplus(
        jnp.dot(dt_low, wdt_ref[...], preferred_element_type=F32) + bdt_ref[...])

    # ---- discretization on the flattened state (lane index = n*d_inner + d)
    delta_rep = jnp.concatenate([delta] * d_state, axis=1)            # (L, SD)
    w_rep = jnp.concatenate([delta * xc] * d_state, axis=1)           # (L, SD)
    dA_scr[...] = jnp.exp(delta_rep * aflat_ref[...])
    dBu_scr[...] = w_rep * jnp.dot(B, k_ref[...], preferred_element_type=F32)
    c_rep = jnp.dot(C, k_ref[...], preferred_element_type=F32)        # (L, SD)

    # ---- selective scan: fully unrolled (L static), state carried in vregs,
    #      history materialized with a single concatenate (no per-row stores)
    h = jnp.zeros((1, d_state * d_inner), F32)
    hist = []
    for l in range(L):
        h = dA_scr[pl.ds(l, 1), :] * h + dBu_scr[pl.ds(l, 1), :]
        hist.append(h)
    hist = jnp.concatenate(hist, axis=0)                              # (L, SD)

    # ---- readout, D skip, SiLU gate, out_proj
    y = jnp.dot(hist * c_rep, s_ref[...], preferred_element_type=F32)  # (L, d_inner)
    y = y + xc * dvec_ref[...]
    y = y * _silu(z)
    out = jnp.dot(y, wout_ref[...], preferred_element_type=F32)        # (L, d_model)

    # ---- head: Linear(12, 1) on the last timestep (one-hot select, no slice)
    sel = (jax.lax.broadcasted_iota(jnp.int32, (1, L), 1) == (L - 1)).astype(F32)
    last = jnp.dot(sel, out, preferred_element_type=F32)               # (1, d_model)
    pred_ref[...] = (jnp.dot(last, linw_ref[...], preferred_element_type=F32)
                     + linb_ref[...])


# ----------------------------------------------------------------------------
# Parameter construction (deterministic) + folding/fusion for the kernel
# ----------------------------------------------------------------------------
def init_params(key, *, in_channels, out_in_channels, d_state, d_conv,
                d_inner, dt_rank, d_model=12):
    keys = iter(jax.random.split(key, 64))

    def rnd(shape, scale=0.1):
        return (scale * jax.random.normal(next(keys), shape)).astype(F32)

    p = {}
    # conv block (1x1 convs stored as (in, out) matrices) + BatchNorm stats
    p['conv1_w'] = rnd((in_channels, out_in_channels))
    p['conv1_b'] = rnd((out_in_channels,))
    p['bn1_gamma'] = 1.0 + rnd((out_in_channels,))
    p['bn1_beta'] = rnd((out_in_channels,))
    p['bn1_mean'] = rnd((out_in_channels,))
    p['bn1_var'] = 1.0 + jnp.abs(rnd((out_in_channels,)))
    p['conv2_w'] = rnd((out_in_channels, 1))
    p['conv2_b'] = rnd((1,))
    p['bn2_gamma'] = 1.0 + rnd((1,))
    p['bn2_beta'] = rnd((1,))
    p['bn2_mean'] = rnd((1,))
    p['bn2_var'] = 1.0 + jnp.abs(rnd((1,)))

    # Mamba block (mamba-minimal parameterization)
    p['win_x'] = rnd((d_model, d_inner))
    p['win_z'] = rnd((d_model, d_inner))
    p['conv1d_w'] = rnd((d_conv, d_inner))
    p['conv1d_b'] = rnd((d_inner,))
    p['wx_dt'] = rnd((d_inner, dt_rank))
    p['wx_B'] = rnd((d_inner, d_state))
    p['wx_C'] = rnd((d_inner, d_state))
    p['w_dt'] = rnd((dt_rank, d_inner))
    p['b_dt'] = rnd((d_inner,))
    p['A_log'] = jnp.log(jnp.tile(jnp.arange(1, d_state + 1, dtype=F32)[None, :],
                                  (d_inner, 1)))        # (d_inner, d_state)
    p['D'] = jnp.ones((d_inner,), F32)
    p['w_out'] = rnd((d_inner, d_model))

    # head: Linear(12, 1)
    p['lin_w'] = rnd((d_model, 1))
    p['lin_b'] = rnd((1,))
    return p


def prepare_kernel_params(p, *, H, W, d_state, d_conv, d_inner, dt_rank):
    """Fold eval-mode BN, fuse projections, build block-diag / shift helpers."""
    eps = 1e-5
    # TODO(synk): BatchNorm is folded in eval mode (running stats); the
    # training-mode batch-statistics path is not reproduced.
    s1 = p['bn1_gamma'] / jnp.sqrt(p['bn1_var'] + eps)
    t1 = p['bn1_beta'] - p['bn1_mean'] * s1
    w1 = p['conv1_w'] * s1[None, :]
    b1 = p['conv1_b'] * s1 + t1
    s2 = p['bn2_gamma'] / jnp.sqrt(p['bn2_var'] + eps)
    t2 = p['bn2_beta'] - p['bn2_mean'] * s2
    w2 = p['conv2_w'] * s2[None, :]
    b2 = p['conv2_b'] * s2 + t2

    kp = {}
    # block-diagonal 1x1-conv form acting on the (H, W*Cin) pixel slab
    kp['cw1'] = jnp.kron(jnp.eye(W, dtype=F32), w1)          # (W*Cin, W*Cmid)
    kp['cb1'] = jnp.tile(b1[None, :], (1, W))                # (1, W*Cmid)
    kp['cw2'] = jnp.kron(jnp.eye(W, dtype=F32), w2)          # (W*Cmid, W)
    kp['cb2'] = jnp.tile(b2[None, :], (1, W))                # (1, W)

    # fused Mamba projections
    kp['win_xz'] = jnp.concatenate([p['win_x'], p['win_z']], axis=1)   # (12, 2*di)
    kp['wx_dtbc'] = jnp.concatenate([p['wx_dt'], p['wx_B'], p['wx_C']], axis=1)
    kp['w_dt'] = p['w_dt']
    kp['b_dt'] = p['b_dt'][None, :]
    kp['conv1d_w'] = p['conv1d_w']
    kp['conv1d_b'] = p['conv1d_b'][None, :]

    # causal depthwise conv1d shift matrices: tap k <-> shift d_conv-1-k
    kp['shift'] = jnp.stack([jnp.eye(H, H, k=-(d_conv - 1 - k), dtype=F32)
                             for k in range(d_conv - 1)])    # (d_conv-1, H, H)

    # flattened-state SSM helpers (lane index = n*d_inner + d)
    A = -jnp.exp(p['A_log'])                                 # (d_inner, d_state)
    kp['a_flat'] = A.T.reshape(1, d_state * d_inner)
    kp['k_mat'] = jnp.repeat(jnp.eye(d_state, dtype=F32), d_inner, axis=1)
    kp['s_mat'] = jnp.concatenate([jnp.eye(d_inner, dtype=F32)] * d_state, axis=0)
    kp['d_vec'] = p['D'][None, :]
    kp['w_out'] = p['w_out']

    kp['lin_w'] = p['lin_w']
    kp['lin_b'] = p['lin_b'][None, :]
    return kp


# ----------------------------------------------------------------------------
# Forward wrapper: one pallas_call, no grid (everything fits in VMEM)
# ----------------------------------------------------------------------------
@jax.jit
def omamba_forward(x, kp):
    # x: (1, Cin, H, W) NCHW, W = d_model = 12
    _, Cin, H, W = x.shape
    L = H
    d_inner = kp['conv1d_w'].shape[1]
    d_state = kp['k_mat'].shape[0]
    dt_rank = kp['w_dt'].shape[0]

    # layout plumbing in the wrapper: NCHW -> (H, W*Cin) slab, lane = w*Cin + c
    xw = jnp.transpose(x[0], (1, 2, 0)).reshape(H, W * Cin).astype(F32)

    vmem = pl.BlockSpec(memory_space=pltpu.MemorySpace.VMEM)
    pred = pl.pallas_call(
        omamba_kernel,
        out_shape=jax.ShapeDtypeStruct((1, 1), F32),
        in_specs=[vmem] * 19,
        out_specs=vmem,
        scratch_shapes=[
            pltpu.VMEM((L, 2 * d_inner), F32),                # fused x||z
            pltpu.VMEM((L, dt_rank + 2 * d_state), F32),      # fused dt||B||C
            pltpu.VMEM((L, d_state * d_inner), F32),          # dA
            pltpu.VMEM((L, d_state * d_inner), F32),          # dB*u
        ],
    )(xw,
      kp['cw1'], kp['cb1'], kp['cw2'], kp['cb2'],
      kp['win_xz'], kp['shift'], kp['conv1d_w'], kp['conv1d_b'],
      kp['wx_dtbc'], kp['w_dt'], kp['b_dt'],
      kp['a_flat'], kp['k_mat'], kp['s_mat'], kp['d_vec'], kp['w_out'],
      kp['lin_w'], kp['lin_b'])
    return pred


if __name__ == "__main__":
    # module hyperparameters (d_model is fixed to 12 by the module)
    in_channels = 4
    out_in_channels = 8
    H = 16                  # conv spatial H == Mamba sequence length
    W = 12                  # conv spatial W == d_model
    d_state = 4
    d_conv = 4
    expand = 2
    d_inner = expand * W    # 24
    dt_rank = 4

    key = jax.random.PRNGKey(0)
    kx, kparam = jax.random.split(key)
    x = jax.random.normal(kx, (1, in_channels, H, W), dtype=F32)
    raw = init_params(kparam, in_channels=in_channels,
                      out_in_channels=out_in_channels, d_state=d_state,
                      d_conv=d_conv, d_inner=d_inner, dt_rank=dt_rank,
                      d_model=W)
    kp = prepare_kernel_params(raw, H=H, W=W, d_state=d_state, d_conv=d_conv,
                               d_inner=d_inner, dt_rank=dt_rank)

    pred = omamba_forward(x, kp)
    jax.block_until_ready(pred)
    assert pred.shape == (1, 1)
    print("KERNEL_OK")
</pallas_src>

<mosaic_0001>
module attributes {stable_mosaic.version = 11 : i64} {
  func.func @omamba_kernel(%arg0: memref<16x48xf32, #tpu.memory_space<vmem>>, %arg1: memref<48x96xf32, #tpu.memory_space<vmem>>, %arg2: memref<1x96xf32, #tpu.memory_space<vmem>>, %arg3: memref<96x12xf32, #tpu.memory_space<vmem>>, %arg4: memref<1x12xf32, #tpu.memory_space<vmem>>, %arg5: memref<12x48xf32, #tpu.memory_space<vmem>>, %arg6: memref<3x16x16xf32, #tpu.memory_space<vmem>>, %arg7: memref<4x24xf32, #tpu.memory_space<vmem>>, %arg8: memref<1x24xf32, #tpu.memory_space<vmem>>, %arg9: memref<24x12xf32, #tpu.memory_space<vmem>>, %arg10: memref<4x24xf32, #tpu.memory_space<vmem>>, %arg11: memref<1x24xf32, #tpu.memory_space<vmem>>, %arg12: memref<1x96xf32, #tpu.memory_space<vmem>>, %arg13: memref<4x96xf32, #tpu.memory_space<vmem>>, %arg14: memref<96x24xf32, #tpu.memory_space<vmem>>, %arg15: memref<1x24xf32, #tpu.memory_space<vmem>>, %arg16: memref<24x12xf32, #tpu.memory_space<vmem>>, %arg17: memref<12x1xf32, #tpu.memory_space<vmem>>, %arg18: memref<1x1xf32, #tpu.memory_space<vmem>>, %arg19: memref<1x1xf32, #tpu.memory_space<vmem>>, %arg20: memref<16x48xf32, #tpu.memory_space<vmem>>, %arg21: memref<16x12xf32, #tpu.memory_space<vmem>>, %arg22: memref<16x96xf32, #tpu.memory_space<vmem>>, %arg23: memref<16x96xf32, #tpu.memory_space<vmem>>) attributes {dimension_semantics = [], scalar_prefetch = 0 : i64, scratch_operands = 4 : i64, tpu.core_type = #tpu.core_type<tc>} {
    %c0 = arith.constant 0 : index
    %c0_0 = arith.constant 0 : index
    %0 = vector.load %arg0[%c0, %c0_0] : memref<16x48xf32, #tpu.memory_space<vmem>>, vector<16x48xf32>
    %c0_1 = arith.constant 0 : index
    %c0_2 = arith.constant 0 : index
    %1 = vector.load %arg1[%c0_1, %c0_2] : memref<48x96xf32, #tpu.memory_space<vmem>>, vector<48x96xf32>
    %cst = arith.constant dense<0.000000e+00> : vector<16x96xf32>
    %2 = tpu.matmul %0, %1, %cst {dimension_numbers = #tpu.dot_dimension_numbers<[1], [0], [0], [1], [0, 0, 1, 1], [], []>} : vector<16x48xf32>, vector<48x96xf32>, vector<16x96xf32> -> vector<16x96xf32>
    %c0_3 = arith.constant 0 : index
    %c0_4 = arith.constant 0 : index
    %3 = vector.load %arg2[%c0_3, %c0_4] : memref<1x96xf32, #tpu.memory_space<vmem>>, vector<1x96xf32>
    %4 = vector.broadcast %3 : vector<1x96xf32> to vector<16x96xf32>
    %5 = arith.addf %2, %4 : vector<16x96xf32>
    %cst_5 = arith.constant 0.000000e+00 : f32
    %6 = vector.broadcast %cst_5 : f32 to vector<16x96xf32>
    %7 = arith.maximumf %5, %6 : vector<16x96xf32>
    %c0_6 = arith.constant 0 : index
    %c0_7 = arith.constant 0 : index
    %8 = vector.load %arg3[%c0_6, %c0_7] : memref<96x12xf32, #tpu.memory_space<vmem>>, vector<96x12xf32>
    %cst_8 = arith.constant dense<0.000000e+00> : vector<16x12xf32>
    %9 = tpu.matmul %7, %8, %cst_8 {dimension_numbers = #tpu.dot_dimension_numbers<[1], [0], [0], [1], [0, 0, 1, 1], [], []>} : vector<16x96xf32>, vector<96x12xf32>, vector<16x12xf32> -> vector<16x12xf32>
    %c0_9 = arith.constant 0 : index
    %c0_10 = arith.constant 0 : index
    %10 = vector.load %arg4[%c0_9, %c0_10] : memref<1x12xf32, #tpu.memory_space<vmem>>, vector<1x12xf32>
    %11 = vector.broadcast %10 : vector<1x12xf32> to vector<16x12xf32>
    %12 = arith.addf %9, %11 : vector<16x12xf32>
    %cst_11 = arith.constant 0.000000e+00 : f32
    %13 = vector.broadcast %cst_11 : f32 to vector<16x12xf32>
    %14 = arith.maximumf %12, %13 : vector<16x12xf32>
    %c0_12 = arith.constant 0 : index
    %c0_13 = arith.constant 0 : index
    %15 = vector.load %arg5[%c0_12, %c0_13] : memref<12x48xf32, #tpu.memory_space<vmem>>, vector<12x48xf32>
    %cst_14 = arith.constant dense<0.000000e+00> : vector<16x48xf32>
    %16 = tpu.matmul %14, %15, %cst_14 {dimension_numbers = #tpu.dot_dimension_numbers<[1], [0], [0], [1], [0, 0, 1, 1], [], []>} : vector<16x12xf32>, vector<12x48xf32>, vector<16x48xf32> -> vector<16x48xf32>
    %c0_15 = arith.constant 0 : index
    %c0_16 = arith.constant 0 : index
    %17 = vector.load %arg20[%c0_15, %c0_16] : memref<16x48xf32, #tpu.memory_space<vmem>>, vector<16x48xf32>
    tpu.vector_store %arg20[%c0_15, %c0_16], %16 {strides = array<i32>} : memref<16x48xf32, #tpu.memory_space<vmem>>, vector<16x48xf32>,
    %c0_17 = arith.constant 0 : index
    %c0_18 = arith.constant 0 : index
    %18 = vector.load %arg20[%c0_17, %c0_18] : memref<16x48xf32, #tpu.memory_space<vmem>>, vector<16x24xf32>
    %c0_19 = arith.constant 0 : index
    %c24 = arith.constant 24 : index
    %19 = vector.load %arg20[%c0_19, %c24] : memref<16x48xf32, #tpu.memory_space<vmem>>, vector<16x24xf32>
    %c3 = arith.constant 3 : index
    %c0_20 = arith.constant 0 : index
    %20 = vector.load %arg7[%c3, %c0_20] : memref<4x24xf32, #tpu.memory_space<vmem>>, vector<1x24xf32>
    %21 = vector.broadcast %20 : vector<1x24xf32> to vector<16x24xf32>
    %22 = arith.mulf %18, %21 : vector<16x24xf32>
    %c0_21 = arith.constant 0 : index
    %c0_22 = arith.constant 0 : index
    %c0_23 = arith.constant 0 : index
    %23 = vector.load %arg6[%c0_21, %c0_22, %c0_23] : memref<3x16x16xf32, #tpu.memory_space<vmem>>, vector<1x16x16xf32>
    %24 = vector.shape_cast %23 : vector<1x16x16xf32> to vector<16x16xf32>
    %cst_24 = arith.constant dense<0.000000e+00> : vector<16x24xf32>
    %25 = tpu.matmul %24, %18, %cst_24 {dimension_numbers = #tpu.dot_dimension_numbers<[1], [0], [0], [1], [0, 0, 1, 1], [], []>} : vector<16x16xf32>, vector<16x24xf32>, vector<16x24xf32> -> vector<16x24xf32>
    %c0_25 = arith.constant 0 : index
    %c0_26 = arith.constant 0 : index
    %26 = vector.load %arg7[%c0_25, %c0_26] : memref<4x24xf32, #tpu.memory_space<vmem>>, vector<1x24xf32>
    %27 = vector.broadcast %26 : vector<1x24xf32> to vector<16x24xf32>
    %28 = arith.mulf %25, %27 : vector<16x24xf32>
    %29 = arith.addf %22, %28 : vector<16x24xf32>
    %c1 = arith.constant 1 : index
    %c0_27 = arith.constant 0 : index
    %c0_28 = arith.constant 0 : index
    %30 = vector.load %arg6[%c1, %c0_27, %c0_28] : memref<3x16x16xf32, #tpu.memory_space<vmem>>, vector<1x16x16xf32>
    %31 = vector.shape_cast %30 : vector<1x16x16xf32> to vector<16x16xf32>
    %cst_29 = arith.constant dense<0.000000e+00> : vector<16x24xf32>
    %32 = tpu.matmul %31, %18, %cst_29 {dimension_numbers = #tpu.dot_dimension_numbers<[1], [0], [0], [1], [0, 0, 1, 1], [], []>} : vector<16x16xf32>, vector<16x24xf32>, vector<16x24xf32> -> vector<16x24xf32>
    %c1_30 = arith.constant 1 : index
    %c0_31 = arith.constant 0 : index
    %33 = vector.load %arg7[%c1_30, %c0_31] : memref<4x24xf32, #tpu.memory_space<vmem>>, vector<1x24xf32>
    %34 = vector.broadcast %33 : vector<1x24xf32> to vector<16x24xf32>
    %35 = arith.mulf %32, %34 : vector<16x24xf32>
    %36 = arith.addf %29, %35 : vector<16x24xf32>
    %c2 = arith.constant 2 : index
    %c0_32 = arith.constant 0 : index
    %c0_33 = arith.constant 0 : index
    %37 = vector.load %arg6[%c2, %c0_32, %c0_33] : memref<3x16x16xf32, #tpu.memory_space<vmem>>, vector<1x16x16xf32>
    %38 = vector.shape_cast %37 : vector<1x16x16xf32> to vector<16x16xf32>
    %cst_34 = arith.constant dense<0.000000e+00> : vector<16x24xf32>
    %39 = tpu.matmul %38, %18, %cst_34 {dimension_numbers = #tpu.dot_dimension_numbers<[1], [0], [0], [1], [0, 0, 1, 1], [], []>} : vector<16x16xf32>, vector<16x24xf32>, vector<16x24xf32> -> vector<16x24xf32>
    %c2_35 = arith.constant 2 : index
    %c0_36 = arith.constant 0 : index
    %40 = vector.load %arg7[%c2_35, %c0_36] : memref<4x24xf32, #tpu.memory_space<vmem>>, vector<1x24xf32>
    %41 = vector.broadcast %40 : vector<1x24xf32> to vector<16x24xf32>
    %42 = arith.mulf %39, %41 : vector<16x24xf32>
    %43 = arith.addf %36, %42 : vector<16x24xf32>
    %c0_37 = arith.constant 0 : index
    %c0_38 = arith.constant 0 : index
    %44 = vector.load %arg8[%c0_37, %c0_38] : memref<1x24xf32, #tpu.memory_space<vmem>>, vector<1x24xf32>
    %45 = vector.broadcast %44 : vector<1x24xf32> to vector<16x24xf32>
    %46 = arith.addf %43, %45 : vector<16x24xf32>
    %cst_39 = arith.constant 5.000000e-01 : f32
    %47 = vector.broadcast %cst_39 : f32 to vector<16x24xf32>
    %48 = arith.mulf %47, %46 : vector<16x24xf32>
    %49 = math.tanh %48 : vector<16x24xf32>
    %cst_40 = arith.constant 5.000000e-01 : f32
    %50 = vector.broadcast %cst_40 : f32 to vector<16x24xf32>
    %51 = arith.mulf %50, %49 : vector<16x24xf32>
    %cst_41 = arith.constant 5.000000e-01 : f32
    %52 = vector.broadcast %cst_41 : f32 to vector<16x24xf32>
    %53 = arith.addf %51, %52 : vector<16x24xf32>
    %54 = arith.mulf %46, %53 : vector<16x24xf32>
    %c0_42 = arith.constant 0 : index
    %c0_43 = arith.constant 0 : index
    %55 = vector.load %arg9[%c0_42, %c0_43] : memref<24x12xf32, #tpu.memory_space<vmem>>, vector<24x12xf32>
    %cst_44 = arith.constant dense<0.000000e+00> : vector<16x12xf32>
    %56 = tpu.matmul %54, %55, %cst_44 {dimension_numbers = #tpu.dot_dimension_numbers<[1], [0], [0], [1], [0, 0, 1, 1], [], []>} : vector<16x24xf32>, vector<24x12xf32>, vector<16x12xf32> -> vector<16x12xf32>
    %c0_45 = arith.constant 0 : index
    %c0_46 = arith.constant 0 : index
    %57 = vector.load %arg21[%c0_45, %c0_46] : memref<16x12xf32, #tpu.memory_space<vmem>>, vector<16x12xf32>
    tpu.vector_store %arg21[%c0_45, %c0_46], %56 {strides = array<i32>} : memref<16x12xf32, #tpu.memory_space<vmem>>, vector<16x12xf32>,
    %c0_47 = arith.constant 0 : index
    %c0_48 = arith.constant 0 : index
    %58 = vector.load %arg21[%c0_47, %c0_48] : memref<16x12xf32, #tpu.memory_space<vmem>>, vector<16x4xf32>
    %c0_49 = arith.constant 0 : index
    %c4 = arith.constant 4 : index
    %59 = vector.load %arg21[%c0_49, %c4] : memref<16x12xf32, #tpu.memory_space<vmem>>, vector<16x4xf32>
    %c0_50 = arith.constant 0 : index
    %c8 = arith.constant 8 : index
    %60 = vector.load %arg21[%c0_50, %c8] : memref<16x12xf32, #tpu.memory_space<vmem>>, vector<16x4xf32>
    %c0_51 = arith.constant 0 : index
    %c0_52 = arith.constant 0 : index
    %61 = vector.load %arg10[%c0_51, %c0_52] : memref<4x24xf32, #tpu.memory_space<vmem>>, vector<4x24xf32>
    %cst_53 = arith.constant dense<0.000000e+00> : vector<16x24xf32>
    %62 = tpu.matmul %58, %61, %cst_53 {dimension_numbers = #tpu.dot_dimension_numbers<[1], [0], [0], [1], [0, 0, 1, 1], [], []>} : vector<16x4xf32>, vector<4x24xf32>, vector<16x24xf32> -> vector<16x24xf32>
    %c0_54 = arith.constant 0 : index
    %c0_55 = arith.constant 0 : index
    %63 = vector.load %arg11[%c0_54, %c0_55] : memref<1x24xf32, #tpu.memory_space<vmem>>, vector<1x24xf32>
    %64 = vector.broadcast %63 : vector<1x24xf32> to vector<16x24xf32>
    %65 = arith.addf %62, %64 : vector<16x24xf32>
    %cst_56 = arith.constant 0.000000e+00 : f32
    %66 = vector.broadcast %cst_56 : f32 to vector<16x24xf32>
    %67 = arith.maximumf %65, %66 : vector<16x24xf32>
    %68 = math.absf %65 : vector<16x24xf32>
    %cst_57 = arith.constant 0.000000e+00 : f32
    %69 = vector.broadcast %cst_57 : f32 to vector<16x24xf32>
    %70 = arith.subf %69, %68 : vector<16x24xf32>
    %71 = math.exp %70 : vector<16x24xf32>
    %72 = math.log1p %71 : vector<16x24xf32>
    %73 = arith.addf %67, %72 : vector<16x24xf32>
    %74 = tpu.concatenate %73, %73, %73, %73 in 1 : vector<16x24xf32>, vector<16x24xf32>, vector<16x24xf32>, vector<16x24xf32> -> vector<16x96xf32>
    %75 = arith.mulf %73, %54 : vector<16x24xf32>
    %76 = tpu.concatenate %75, %75, %75, %75 in 1 : vector<16x24xf32>, vector<16x24xf32>, vector<16x24xf32>, vector<16x24xf32> -> vector<16x96xf32>
    %c0_58 = arith.constant 0 : index
    %c0_59 = arith.constant 0 : index
    %77 = vector.load %arg12[%c0_58, %c0_59] : memref<1x96xf32, #tpu.memory_space<vmem>>, vector<1x96xf32>
    %78 = vector.broadcast %77 : vector<1x96xf32> to vector<16x96xf32>
    %79 = arith.mulf %74, %78 : vector<16x96xf32>
    %80 = math.exp %79 : vector<16x96xf32>
    %c0_60 = arith.constant 0 : index
    %c0_61 = arith.constant 0 : index
    %81 = vector.load %arg22[%c0_60, %c0_61] : memref<16x96xf32, #tpu.memory_space<vmem>>, vector<16x96xf32>
    tpu.vector_store %arg22[%c0_60, %c0_61], %80 {strides = array<i32>} : memref<16x96xf32, #tpu.memory_space<vmem>>, vector<16x96xf32>,
    %c0_62 = arith.constant 0 : index
    %c0_63 = arith.constant 0 : index
    %82 = vector.load %arg13[%c0_62, %c0_63] : memref<4x96xf32, #tpu.memory_space<vmem>>, vector<4x96xf32>
    %cst_64 = arith.constant dense<0.000000e+00> : vector<16x96xf32>
    %83 = tpu.matmul %59, %82, %cst_64 {dimension_numbers = #tpu.dot_dimension_numbers<[1], [0], [0], [1], [0, 0, 1, 1], [], []>} : vector<16x4xf32>, vector<4x96xf32>, vector<16x96xf32> -> vector<16x96xf32>
    %84 = arith.mulf %76, %83 : vector<16x96xf32>
    %c0_65 = arith.constant 0 : index
    %c0_66 = arith.constant 0 : index
    %85 = vector.load %arg23[%c0_65, %c0_66] : memref<16x96xf32, #tpu.memory_space<vmem>>, vector<16x96xf32>
    tpu.vector_store %arg23[%c0_65, %c0_66], %84 {strides = array<i32>} : memref<16x96xf32, #tpu.memory_space<vmem>>, vector<16x96xf32>,
    %c0_67 = arith.constant 0 : index
    %c0_68 = arith.constant 0 : index
    %86 = vector.load %arg13[%c0_67, %c0_68] : memref<4x96xf32, #tpu.memory_space<vmem>>, vector<4x96xf32>
    %cst_69 = arith.constant dense<0.000000e+00> : vector<16x96xf32>
    %87 = tpu.matmul %60, %86, %cst_69 {dimension_numbers = #tpu.dot_dimension_numbers<[1], [0], [0], [1], [0, 0, 1, 1], [], []>} : vector<16x4xf32>, vector<4x96xf32>, vector<16x96xf32> -> vector<16x96xf32>
    %cst_70 = arith.constant 0.000000e+00 : f32
    %88 = vector.broadcast %cst_70 : f32 to vector<1x96xf32>
    %c0_71 = arith.constant 0 : index
    %c0_72 = arith.constant 0 : index
    %89 = vector.load %arg22[%c0_71, %c0_72] : memref<16x96xf32, #tpu.memory_space<vmem>>, vector<1x96xf32>
    %90 = arith.mulf %89, %88 : vector<1x96xf32>
    %c0_73 = arith.constant 0 : index
    %c0_74 = arith.constant 0 : index
    %91 = vector.load %arg23[%c0_73, %c0_74] : memref<16x96xf32, #tpu.memory_space<vmem>>, vector<1x96xf32>
    %92 = arith.addf %90, %91 : vector<1x96xf32>
    %c1_75 = arith.constant 1 : index
    %c0_76 = arith.constant 0 : index
    %93 = vector.load %arg22[%c1_75, %c0_76] : memref<16x96xf32, #tpu.memory_space<vmem>>, vector<1x96xf32>
    %94 = arith.mulf %93, %92 : vector<1x96xf32>
    %c1_77 = arith.constant 1 : index
    %c0_78 = arith.constant 0 : index
    %95 = vector.load %arg23[%c1_77, %c0_78] : memref<16x96xf32, #tpu.memory_space<vmem>>, vector<1x96xf32>
    %96 = arith.addf %94, %95 : vector<1x96xf32>
    %c2_79 = arith.constant 2 : index
    %c0_80 = arith.constant 0 : index
    %97 = vector.load %arg22[%c2_79, %c0_80] : memref<16x96xf32, #tpu.memory_space<vmem>>, vector<1x96xf32>
    %98 = arith.mulf %97, %96 : vector<1x96xf32>
    %c2_81 = arith.constant 2 : index
    %c0_82 = arith.constant 0 : index
    %99 = vector.load %arg23[%c2_81, %c0_82] : memref<16x96xf32, #tpu.memory_space<vmem>>, vector<1x96xf32>
    %100 = arith.addf %98, %99 : vector<1x96xf32>
    %c3_83 = arith.constant 3 : index
    %c0_84 = arith.constant 0 : index
    %101 = vector.load %arg22[%c3_83, %c0_84] : memref<16x96xf32, #tpu.memory_space<vmem>>, vector<1x96xf32>
    %102 = arith.mulf %101, %100 : vector<1x96xf32>
    %c3_85 = arith.constant 3 : index
    %c0_86 = arith.constant 0 : index
    %103 = vector.load %arg23[%c3_85, %c0_86] : memref<16x96xf32, #tpu.memory_space<vmem>>, vector<1x96xf32>
    %104 = arith.addf %102, %103 : vector<1x96xf32>
    %c4_87 = arith.constant 4 : index
    %c0_88 = arith.constant 0 : index
    %105 = vector.load %arg22[%c4_87, %c0_88] : memref<16x96xf32, #tpu.memory_space<vmem>>, vector<1x96xf32>
    %106 = arith.mulf %105, %104 : vector<1x96xf32>
    %c4_89 = arith.constant 4 : index
    %c0_90 = arith.constant 0 : index
    %107 = vector.load %arg23[%c4_89, %c0_90] : memref<16x96xf32, #tpu.memory_space<vmem>>, vector<1x96xf32>
    %108 = arith.addf %106, %107 : vector<1x96xf32>
    %c5 = arith.constant 5 : index
    %c0_91 = arith.constant 0 : index
    %109 = vector.load %arg22[%c5, %c0_91] : memref<16x96xf32, #tpu.memory_space<vmem>>, vector<1x96xf32>
    %110 = arith.mulf %109, %108 : vector<1x96xf32>
    %c5_92 = arith.constant 5 : index
    %c0_93 = arith.constant 0 : index
    %111 = vector.load %arg23[%c5_92, %c0_93] : memref<16x96xf32, #tpu.memory_space<vmem>>, vector<1x96xf32>
    %112 = arith.addf %110, %111 : vector<1x96xf32>
    %c6 = arith.constant 6 : index
    %c0_94 = arith.constant 0 : index
    %113 = vector.load %arg22[%c6, %c0_94] : memref<16x96xf32, #tpu.memory_space<vmem>>, vector<1x96xf32>
    %114 = arith.mulf %113, %112 : vector<1x96xf32>
    %c6_95 = arith.constant 6 : index
    %c0_96 = arith.constant 0 : index
    %115 = vector.load %arg23[%c6_95, %c0_96] : memref<16x96xf32, #tpu.memory_space<vmem>>, vector<1x96xf32>
    %116 = arith.addf %114, %115 : vector<1x96xf32>
    %c7 = arith.constant 7 : index
    %c0_97 = arith.constant 0 : index
    %117 = vector.load %arg22[%c7, %c0_97] : memref<16x96xf32, #tpu.memory_space<vmem>>, vector<1x96xf32>
    %118 = arith.mulf %117, %116 : vector<1x96xf32>
    %c7_98 = arith.constant 7 : index
    %c0_99 = arith.constant 0 : index
    %119 = vector.load %arg23[%c7_98, %c0_99] : memref<16x96xf32, #tpu.memory_space<vmem>>, vector<1x96xf32>
    %120 = arith.addf %118, %119 : vector<1x96xf32>
    %c8_100 = arith.constant 8 : index
    %c0_101 = arith.constant 0 : index
    %121 = vector.load %arg22[%c8_100, %c0_101] : memref<16x96xf32, #tpu.memory_space<vmem>>, vector<1x96xf32>
    %122 = arith.mulf %121, %120 : vector<1x96xf32>
    %c8_102 = arith.constant 8 : index
    %c0_103 = arith.constant 0 : index
    %123 = vector.load %arg23[%c8_102, %c0_103] : memref<16x96xf32, #tpu.memory_space<vmem>>, vector<1x96xf32>
    %124 = arith.addf %122, %123 : vector<1x96xf32>
    %c9 = arith.constant 9 : index
    %c0_104 = arith.constant 0 : index
    %125 = vector.load %arg22[%c9, %c0_104] : memref<16x96xf32, #tpu.memory_space<vmem>>, vector<1x96xf32>
    %126 = arith.mulf %125, %124 : vector<1x96xf32>
    %c9_105 = arith.constant 9 : index
    %c0_106 = arith.constant 0 : index
    %127 = vector.load %arg23[%c9_105, %c0_106] : memref<16x96xf32, #tpu.memory_space<vmem>>, vector<1x96xf32>
    %128 = arith.addf %126, %127 : vector<1x96xf32>
    %c10 = arith.constant 10 : index
    %c0_107 = arith.constant 0 : index
    %129 = vector.load %arg22[%c10, %c0_107] : memref<16x96xf32, #tpu.memory_space<vmem>>, vector<1x96xf32>
    %130 = arith.mulf %129, %128 : vector<1x96xf32>
    %c10_108 = arith.constant 10 : index
    %c0_109 = arith.constant 0 : index
    %131 = vector.load %arg23[%c10_108, %c0_109] : memref<16x96xf32, #tpu.memory_space<vmem>>, vector<1x96xf32>
    %132 = arith.addf %130, %131 : vector<1x96xf32>
    %c11 = arith.constant 11 : index
    %c0_110 = arith.constant 0 : index
    %133 = vector.load %arg22[%c11, %c0_110] : memref<16x96xf32, #tpu.memory_space<vmem>>, vector<1x96xf32>
    %134 = arith.mulf %133, %132 : vector<1x96xf32>
    %c11_111 = arith.constant 11 : index
    %c0_112 = arith.constant 0 : index
    %135 = vector.load %arg23[%c11_111, %c0_112] : memref<16x96xf32, #tpu.memory_space<vmem>>, vector<1x96xf32>
    %136 = arith.addf %134, %135 : vector<1x96xf32>
    %c12 = arith.constant 12 : index
    %c0_113 = arith.constant 0 : index
    %137 = vector.load %arg22[%c12, %c0_113] : memref<16x96xf32, #tpu.memory_space<vmem>>, vector<1x96xf32>
    %138 = arith.mulf %137, %136 : vector<1x96xf32>
    %c12_114 = arith.constant 12 : index
    %c0_115 = arith.constant 0 : index
    %139 = vector.load %arg23[%c12_114, %c0_115] : memref<16x96xf32, #tpu.memory_space<vmem>>, vector<1x96xf32>
    %140 = arith.addf %138, %139 : vector<1x96xf32>
    %c13 = arith.constant 13 : index
    %c0_116 = arith.constant 0 : index
    %141 = vector.load %arg22[%c13, %c0_116] : memref<16x96xf32, #tpu.memory_space<vmem>>, vector<1x96xf32>
    %142 = arith.mulf %141, %140 : vector<1x96xf32>
    %c13_117 = arith.constant 13 : index
    %c0_118 = arith.constant 0 : index
    %143 = vector.load %arg23[%c13_117, %c0_118] : memref<16x96xf32, #tpu.memory_space<vmem>>, vector<1x96xf32>
    %144 = arith.addf %142, %143 : vector<1x96xf32>
    %c14 = arith.constant 14 : index
    %c0_119 = arith.constant 0 : index
    %145 = vector.load %arg22[%c14, %c0_119] : memref<16x96xf32, #tpu.memory_space<vmem>>, vector<1x96xf32>
    %146 = arith.mulf %145, %144 : vector<1x96xf32>
    %c14_120 = arith.constant 14 : index
    %c0_121 = arith.constant 0 : index
    %147 = vector.load %arg23[%c14_120, %c0_121] : memref<16x96xf32, #tpu.memory_space<vmem>>, vector<1x96xf32>
    %148 = arith.addf %146, %147 : vector<1x96xf32>
    %c15 = arith.constant 15 : index
    %c0_122 = arith.constant 0 : index
    %149 = vector.load %arg22[%c15, %c0_122] : memref<16x96xf32, #tpu.memory_space<vmem>>, vector<1x96xf32>
    %150 = arith.mulf %149, %148 : vector<1x96xf32>
    %c15_123 = arith.constant 15 : index
    %c0_124 = arith.constant 0 : index
    %151 = vector.load %arg23[%c15_123, %c0_124] : memref<16x96xf32, #tpu.memory_space<vmem>>, vector<1x96xf32>
    %152 = arith.addf %150, %151 : vector<1x96xf32>
    %153 = tpu.concatenate %92, %96, %100, %104, %108, %112, %116, %120, %124, %128, %132, %136, %140, %144, %148, %152 in 0 : vector<1x96xf32>, vector<1x96xf32>, vector<1x96xf32>, vector<1x96xf32>, vector<1x96xf32>, vector<1x96xf32>, vector<1x96xf32>, vector<1x96xf32>, vector<1x96xf32>, vector<1x96xf32>, vector<1x96xf32>, vector<1x96xf32>, vector<1x96xf32>, vector<1x96xf32>, vector<1x96xf32>, vector<1x96xf32> -> vector<16x96xf32>
    %154 = arith.mulf %153, %87 : vector<16x96xf32>
    %c0_125 = arith.constant 0 : index
    %c0_126 = arith.constant 0 : index
    %155 = vector.load %arg14[%c0_125, %c0_126] : memref<96x24xf32, #tpu.memory_space<vmem>>, vector<96x24xf32>
    %cst_127 = arith.constant dense<0.000000e+00> : vector<16x24xf32>
    %156 = tpu.matmul %154, %155, %cst_127 {dimension_numbers = #tpu.dot_dimension_numbers<[1], [0], [0], [1], [0, 0, 1, 1], [], []>} : vector<16x96xf32>, vector<96x24xf32>, vector<16x24xf32> -> vector<16x24xf32>
    %c0_128 = arith.constant 0 : index
    %c0_129 = arith.constant 0 : index
    %157 = vector.load %arg15[%c0_128, %c0_129] : memref<1x24xf32, #tpu.memory_space<vmem>>, vector<1x24xf32>
    %158 = vector.broadcast %157 : vector<1x24xf32> to vector<16x24xf32>
    %159 = arith.mulf %54, %158 : vector<16x24xf32>
    %160 = arith.addf %156, %159 : vector<16x24xf32>
    %cst_130 = arith.constant 5.000000e-01 : f32
    %161 = vector.broadcast %cst_130 : f32 to vector<16x24xf32>
    %162 = arith.mulf %161, %19 : vector<16x24xf32>
    %163 = math.tanh %162 : vector<16x24xf32>
    %cst_131 = arith.constant 5.000000e-01 : f32
    %164 = vector.broadcast %cst_131 : f32 to vector<16x24xf32>
    %165 = arith.mulf %164, %163 : vector<16x24xf32>
    %cst_132 = arith.constant 5.000000e-01 : f32
    %166 = vector.broadcast %cst_132 : f32 to vector<16x24xf32>
    %167 = arith.addf %165, %166 : vector<16x24xf32>
    %168 = arith.mulf %19, %167 : vector<16x24xf32>
    %169 = arith.mulf %160, %168 : vector<16x24xf32>
    %c0_133 = arith.constant 0 : index
    %c0_134 = arith.constant 0 : index
    %170 = vector.load %arg16[%c0_133, %c0_134] : memref<24x12xf32, #tpu.memory_space<vmem>>, vector<24x12xf32>
    %cst_135 = arith.constant dense<0.000000e+00> : vector<16x12xf32>
    %171 = tpu.matmul %169, %170, %cst_135 {dimension_numbers = #tpu.dot_dimension_numbers<[1], [0], [0], [1], [0, 0, 1, 1], [], []>} : vector<16x24xf32>, vector<24x12xf32>, vector<16x12xf32> -> vector<16x12xf32>
    %172 = tpu.iota {dimensions = array<i32: 1>} : vector<1x16xi32>
    %c15_i32 = arith.constant 15 : i32
    %173 = vector.broadcast %c15_i32 : i32 to vector<1x16xi32>
    %174 = arith.cmpi eq, %172, %173 : vector<1x16xi32>
    %175 = arith.extui %174 : vector<1x16xi1> to vector<1x16xi32>
    %176 = arith.sitofp %175 : vector<1x16xi32> to vector<1x16xf32>
    %cst_136 = arith.constant dense<0.000000e+00> : vector<1x12xf32>
    %177 = tpu.matmul %176, %171, %cst_136 {dimension_numbers = #tpu.dot_dimension_numbers<[1], [0], [0], [1], [0, 0, 1, 1], [], []>} : vector<1x16xf32>, vector<16x12xf32>, vector<1x12xf32> -> vector<1x12xf32>
    %c0_137 = arith.constant 0 : index
    %c0_138 = arith.constant 0 : index
    %178 = vector.load %arg17[%c0_137, %c0_138] : memref<12x1xf32, #tpu.memory_space<vmem>>, vector<12x1xf32>
    %cst_139 = arith.constant dense<0.000000e+00> : vector<1x1xf32>
    %179 = tpu.matmul %177, %178, %cst_139 {dimension_numbers = #tpu.dot_dimension_numbers<[1], [0], [0], [1], [0, 0, 1, 1], [], []>} : vector<1x12xf32>, vector<12x1xf32>, vector<1x1xf32> -> vector<1x1xf32>
    %c0_140 = arith.constant 0 : index
    %c0_141 = arith.constant 0 : index
    %180 = vector.load %arg18[%c0_140, %c0_141] : memref<1x1xf32, #tpu.memory_space<vmem>>, vector<1x1xf32>
    %181 = arith.addf %179, %180 : vector<1x1xf32>
    %c0_142 = arith.constant 0 : index
    %c0_143 = arith.constant 0 : index
    %182 = vector.load %arg19[%c0_142, %c0_143] : memref<1x1xf32, #tpu.memory_space<vmem>>, vector<1x1xf32>
    tpu.vector_store %arg19[%c0_142, %c0_143], %181 {strides = array<i32>} : memref<1x1xf32, #tpu.memory_space<vmem>>, vector<1x1xf32>,
    return
  }
}

</mosaic_0001>

<bundles_post_ra>
// kernel: omamba_forward.1
= control target key start
LH: loop header
LB: loop body
LE: loop exit
PB: predicated region body
PF: predicated region fallthrough
CT: control target
= control target key end

     0   :  { %s2492_s0 = inlined_call_operand.vmem [shape: f32[16,48], index: 0, kind: input, shape index: {}]   ;;  %s2493_s1 = inlined_call_operand.vmem [shape: f32[48,96], index: 1, kind: input, shape index: {}]   ;;  %s2494_s2 = inlined_call_operand.vmem [shape: f32[1,96], index: 2, kind: input, shape index: {}]   ;;  %s2495_s3 = inlined_call_operand.vmem [shape: f32[96,12], index: 3, kind: input, shape index: {}]   ;;  %s2496_s4 = inlined_call_operand.vmem [shape: f32[1,12], index: 4, kind: input, shape index: {}]   ;;  %s2497_s5 = inlined_call_operand.vmem [shape: f32[12,48], index: 5, kind: input, shape index: {}]   ;;  %s2498_s6 = inlined_call_operand.vmem [shape: f32[3,16,16], index: 6, kind: input, shape index: {}]   ;;  %s2499_s7 = inlined_call_operand.vmem [shape: f32[4,24], index: 7, kind: input, shape index: {}]   ;;  %s2500_s8 = inlined_call_operand.vmem [shape: f32[1,24], index: 8, kind: input, shape index: {}]   ;;  %s2501_s9 = inlined_call_operand.vmem [shape: f32[24,12], index: 9, kind: input, shape index: {}]   ;;  %s2502_s10 = inlined_call_operand.vmem [shape: f32[4,24], index: 10, kind: input, shape index: {}]   ;;  %s2503_s11 = inlined_call_operand.vmem [shape: f32[1,24], index: 11, kind: input, shape index: {}]   ;;  %s2504_s12 = inlined_call_operand.vmem [shape: f32[1,96], index: 12, kind: input, shape index: {}]   ;;  %s2505_s13 = inlined_call_operand.vmem [shape: f32[4,96], index: 13, kind: input, shape index: {}]   ;;  %s2506_s14 = inlined_call_operand.vmem [shape: f32[96,24], index: 14, kind: input, shape index: {}]   ;;  %s2507_s15 = inlined_call_operand.vmem [shape: f32[1,24], index: 15, kind: input, shape index: {}]   ;;  %s2508_s16 = inlined_call_operand.vmem [shape: f32[24,12], index: 16, kind: input, shape index: {}]   ;;  %s2509_s17 = inlined_call_operand.vmem [shape: f32[12,1], index: 17, kind: input, shape index: {}]   ;;  %s2510_s18 = inlined_call_operand.<no memory space> [shape: f32[1,1], index: 18, kind: input, shape index: {}]   ;;  %s2511_s19 = inlined_call_operand.hbm [shape: f32[1,1], index: 19, kind: output, shape index: {}]  }
   0x1   :  { %2515 = sst [smem:[#allocation10_spill]] %s2492_s0  ;;  %v24_v0 = vstv %s2510_s18 }
   0x2   :  { %2516 = sst [smem:[#allocation11_spill]] %s2493_s1  ;;  %25 = vst [vmem:[#allocation6] sm:$0x1] %v24_v0 }
   0x3   :  { %2517 = sst [smem:[#allocation12_spill]] %s2494_s2 }
   0x4   :  { %2518 = sst [smem:[#allocation13_spill]] %s2495_s3 }
   0x5   :  { %s2519_s1 = sld [smem:[#allocation11_spill]]  ;;  %vm80_vm0 = vcmask 392192   ;;  %s2520_s30 = sld [smem:[#allocation10_spill]] }
   0x6   :  { %s2521_s22 = sld [smem:[#allocation13_spill]] }
   0xb   :  { %v67_v1 = vld [vmem:[%s2519_s1] sm:$0xff]  ;;  %v68_v2 = vld [vmem:[%s2519_s1 + $0x8] sm:$0xff]  ;;  %v69_v3 = vld [vmem:[%s2519_s1 + $0x10] sm:$0xff] }
   0xc   :  { %v1898_v4 = vpack.c.bf16 %v68_v2, %v67_v1  ;;  %v70_v5 = vld [vmem:[%s2519_s1 + $0x18] sm:$0xff]  ;;  %v71_v6 = vld [vmem:[%s2519_s1 + $0x20] sm:$0xff]  ;;  %v72_v8 = vld [vmem:[%s2519_s1 + $0x28] sm:$0xff] }
   0xd   :  { %v1902_v7 = vpack.c.bf16 %v70_v5, %v69_v3  ;;  %v65_v9 = vld [vmem:[%s2520_s30] sm:$0xff]  ;;  %v165_v11 = vld [vmem:[%s2521_s22 + $0x8] sm:$0xff]  ;;  %v166_v12 = vld [vmem:[%s2521_s22 + $0x10] sm:$0xff]  ;;  %v1906_v16 = vpack.c.bf16 %v72_v8, %v71_v6 }
   0xe   :  { %v164_v10 = vld [vmem:[%s2521_s22] sm:$0xff]  ;;  %1899 = vmatprep.subr.bf16.mxu0 %v1898_v4  ;;  %1766 = vmatprep.mubr.msk.f32.mxu0 %vm80_vm0, %v65_v9  ;;  %v167_v13 = vld [vmem:[%s2521_s22 + $0x18] sm:$0xff]  ;;  %v169_v18 = vld [vmem:[%s2521_s22 + $0x28] sm:$0xff] }
   0xf   :  { %1901 = vmatpush3.bf16.msra.mxu0 %v1898_v4  ;;  %v1910_v14 = vpack.c.bf16 %v165_v11, %v164_v10  ;;  %v1914_v15 = vpack.c.bf16 %v167_v13, %v166_v12  ;;  %v168_v17 = vld [vmem:[%s2521_s22 + $0x20] sm:$0xff] }
  0x10   :  { %1903 = vmatprep.subr.bf16.mxu0 %v1902_v7 }
  0x11   :  { %1911 = vmatprep.subr.bf16.mxu1 %v1910_v14 }
  0x12   :  { %26 = vsyncpa [#allocation8], 0  ;;  %1913 = vmatpush3.bf16.msra.mxu1 %v1910_v14  ;;  %v1918_v19 = vpack.c.bf16 %v169_v18, %v168_v17  ;;  %v170_v20 = vld [vmem:[%s2521_s22 + $0x30] sm:$0xff]  ;;  %v171_v21 = vld [vmem:[%s2521_s22 + $0x38] sm:$0xff]  ;;  %s2522_s0 = sld [smem:[#allocation12_spill]]  ;;  %vm183_vm1 = vcmask 785408  }
  0x13   :  { %1905 = vmatpush3.bf16.msra.mxu0 %v1902_v7  ;;  %1915 = vmatprep.subr.bf16.mxu1 %v1914_v15  ;;  %v66_v22 = vld [vmem:[%s2520_s30 + $0x8] sm:$0xff]  ;;  %v1922_v23 = vpack.c.bf16 %v171_v21, %v170_v20  ;;  %v172_v24 = vld [vmem:[%s2521_s22 + $0x40] sm:$0xff]  ;;  %v174_v27 = vld [vmem:[%s2521_s22 + $0x50] sm:$0xff]  ;;  %vm276_vm2 = vcmask 1043456   ;;  %vm2046_vm3 = vmmov 1   ;;  %vm269_vm5 = vcmask 97280  }
  0x14   :  { %1907 = vmatprep.subr.bf16.mxu0 %v1906_v16  ;;  %v173_v25 = vld [vmem:[%s2521_s22 + $0x48] sm:$0xff]  ;;  %v175_v28 = vld [vmem:[%s2521_s22 + $0x58] sm:$0xff]  ;;  %v267_v37 = vld [vmem:[%s2497_s5] sm:$0xff]  ;;  %vm368_vm6 = vcmask 130048   ;;  %vm667_vm7 = vcmask 195584   ;;  %vm761_vm8 = vcmask 31744  }
  0x15   :  { %v1926_v26 = vpack.c.bf16 %v173_v25, %v172_v24  ;;  %v1930_v29 = vpack.c.bf16 %v175_v28, %v174_v27  ;;  %v268_v38 = vld [vmem:[%s2497_s5 + $0x8] sm:$0xf]  ;;  %vm2234_vm4 = vmpackc.low %vm276_vm2, %vm2046_vm3  ;;  %v1634_v41 = vld [vmem:[%s2496_s4] ss:$0 sm:$0xff]  ;;  %s2047_s29 = smov 120   ;;  %s2050_s21 = smov 24  }
  0x16   :  { %1917 = vmatpush3.bf16.msra.mxu1 %v1914_v15  ;;  %v1934_v39 = vpack.c.bf16 %v268_v38, %v267_v37  ;;  %v366_v48 = vld [vmem:[%s2498_s6] sm:$0xff]  ;;  %v367_v54 = vld [vmem:[%s2498_s6 + $0x8] sm:$0xff]  ;;  %v1644_v55 = vld [vmem:[%s2498_s6 + $0x10] sm:$0xff]  ;;  %s2051_s2 = smov 72   ;;  %s2052_s23 = smov 104   ;;  %vm900_vm11 = vcmask 588800  }
  0x17   :  { %1909 = vmatpush3.bf16.msra.mxu0 %v1906_v16  ;;  %1919 = vmatprep.subr.bf16.mxu1 %v1918_v19  ;;  %v1645_v56 = vld [vmem:[%s2498_s6 + $0x18] sm:$0xff]  ;;  %v1649_v57 = vld [vmem:[%s2498_s6 + $0x20] sm:$0xff]  ;;  %v1650_v58 = vld [vmem:[%s2498_s6 + $0x28] sm:$0xff]  ;;  %vm1230_vm12 = vcmask 1040384   ;;  %vm1232_vm13 = vcmask 1041408   ;;  %vm1234_vm14 = vcmask 1042432  }
  0x18   :  { %v1631_v30 = vld [vmem:[%s2522_s0] ss:$0 sm:$0xff]  ;;  %1936 = vmatprep.subr.msk.bf16.mxu0 %vm2234_vm4, %v1934_v39  ;;  %v665_v60 = vld [vmem:[%s2501_s9 + $0x8] sm:$0xff]  ;;  %v666_v62 = vld [vmem:[%s2501_s9 + $0x10] sm:$0xff]  ;;  %vm1237_vm15 = vcmask 1044480   ;;  %vm1241_vm3 = vcmask 1046528  }
  0x19   :  { %v664_v59 = vld [vmem:[%s2501_s9] sm:$0xff]  ;;  %s2056_s30 = smov [#allocation7]  }
  0x1a   :  { %1767 = vmatmul.mubr.msk.f32.vlgmr.msra.gmra.mrb[0].mxu0 %vm80_vm0, %v66_v22  ;;  %1921 = vmatpush3.bf16.msra.mxu1 %v1918_v19  ;;  %v1952_v61 = vpack.c.bf16 %v665_v60, %v664_v59  ;;  %v1640_v63 = vld [vmem:[%s2499_s7 + $0x3] ss:$0 sm:$0xff]  ;;  %v1643_v0 = vld [vmem:[%s2499_s7] ss:$0 sm:$0xff]  ;;  %v1648_v7 = vld [vmem:[%s2499_s7 + $0x1] ss:$0 sm:$0xff] }
  0x1b   :  { %1923 = vmatprep.subr.bf16.mxu1 %v1922_v23  ;;  %1939 = vmatpush3.bf16.msk.msra.mxu0 %vm2234_vm4, %v1934_v39  ;;  %v1653_v14 = vld [vmem:[%s2499_s7 + $0x2] ss:$0 sm:$0xff]  ;;  %v1654_v20 = vld [vmem:[%s2500_s8] ss:$0 sm:$0xff]  ;;  %s1623_s26 = sshll.u32 %s2056_s30, 4  ;;  %s1624_s26 = int_to_ptr.vmem [resolvable:$true] %s1623_s26 }
  0x1c   :  { %v946_v37 = vld [vmem:[%s2505_s13] sm:$0xf]  ;;  %s2026_s7 = scalar_lea.vmem %s1624_s26, 32  ;;  %p2027_p1 = scmp.lt.s32.totalorder %s1624_s26, %s1624_s26 }
  0x1e   :  { %1925 = vmatpush3.bf16.msra.mxu1 %v1922_v23 }
  0x1f   :  { %1927 = vmatprep.subr.bf16.mxu1 %v1926_v26 }
  0x22   :  { %1929 = vmatpush3.bf16.msra.mxu1 %v1926_v26 }
  0x23   :  { %1931 = vmatprep.subr.bf16.mxu1 %v1930_v29 }
  0x26   :  { %1933 = vmatpush3.bf16.msra.mxu1 %v1930_v29 }
  0x27   :  { %1953 = vmatprep.subr.bf16.mxu1 %v1952_v61 }
  0xed   :  { %v1768_v31 = vpop.f32.mrb[0].mxu0 }
  0xee   :  { %v159_v32 = vadd.f32 %v1768_v31, %v1631_v30  ;;  %v153_v33 = vpop.f32.mrb[1].mxu0 }
  0xef   :  { %v154_v34 = vadd.f32 %v1631_v30, %v153_v33 }
  0xf0   :  { %v163_v36 = vmax.f32 %v159_v32, 0.0 }
  0xf1   :  { %v162_v35 = vmax.f32 %v154_v34, 0.0 }
  0xf3   :  { %1793 = vmatprep.mubr.msk.f32.mxu1 %vm183_vm1, %v162_v35 }
  0xf4   :  { %1794 = vmatmul.mubr.msk.f32.vlgmr.msra.gmra.mrb[0].mxu1 %vm183_vm1, %v163_v36  ;;  %v753_v36 = vld [vmem:[%s2502_s10] sm:$0xf]  ;;  %s2048_s10 = smov 124  }
  0xf5   :  { %1955 = vmatpush3.bf16.msra.mxu1 %v1952_v61 }
  0xf6   :  { %1828 = vmatprep.subr.mxu1 %v666_v62 }
  0xf9   :  { %1829 = vmatpush3.msra.mxu1 %v666_v62 }
 0x1c7   :  { %v1795_v42 = vpop.f32.mrb[0].mxu1 }
 0x1c8   :  { %v262_v43 = vadd.f32 %v1795_v42, %v1634_v41  ;;  %v256_v44 = vpop.f32.mrb[1].mxu1 }
 0x1c9   :  { %v257_v45 = vadd.f32 %v1634_v41, %v256_v44 }
 0x1ca   :  { %v266_v47 = vmax.f32 %v262_v43, 0.0  ;;  %v1037_v43 = vld [vmem:[%s2505_s13] sm:$0xf] }
 0x1cb   :  { %v265_v46 = vmax.f32 %v257_v45, 0.0 }
 0x1cd   :  { %1800 = vmatprep.mubr.msk.f32.mxu0 %vm269_vm5, %v265_v46 }
 0x1ce   :  { %1801 = vmatmul.mubr.msk.f32.vlgmr.msra.gmra.mrb[2].mxu0 %vm269_vm5, %v266_v47 }
 0x1cf   :  { %1807 = vmatprep.mubr.msk.f32.mxu0 %vm368_vm6, %v366_v48  ;;  %v1657_v48 = vld [vmem:[%s2503_s11] ss:$0 sm:$0xff]  ;;  %s2049_s11 = smov 48  }
 0x2a1   :  { %v1802_v49 = vpop.f32.mrb[2].mxu0 }
 0x2a2   :  { %356 = vst.msk [vmem:[#allocation2 + $0x8] sm:$0xff] %vm80_vm0, %v1802_v49  ;;  %v346_v50 = vpop.f32.mrb[3].mxu0 }
 0x2a3   :  { %355 = vst.msk [vmem:[#allocation2] sm:$0xff] %vm80_vm0, %v346_v50 }
 0x2a9   :  { %v2253_v51 = vld [vmem:[#allocation2 + $0x8] sm:$0xff] }
 0x2aa   :  { %v2255_v52 = vld [vmem:[#allocation2] sm:$0xff]  ;;  %v365_v2 = vmul.f32 %v1640_v63, %v2253_v51 }
 0x2ab   :  { %v1940_v53 = vpack.c.bf16 %v2253_v51, %v2255_v52  ;;  %v364_v5 = vmul.f32 %v1640_v63, %v2255_v52 }
 0x2ad   :  { %1941 = vmatprep.subr.bf16.mxu0 %v1940_v53 }
 0x2ae   :  { %1943 = vmatpush3.bf16.msra.mxu0 %v1940_v53 }
 0x2af   :  { %1945 = vmatprep.subr.bf16.mxu0 %v1940_v53 }
 0x2b1   :  { %1808 = vmatmul.mubr.msk.f32.vlgmr.msra.gmra.mrb[4].mxu0 %vm368_vm6, %v367_v54 }
 0x2b2   :  { %1947 = vmatpush3.bf16.msra.mxu0 %v1940_v53  ;;  %1814 = vmatprep.mubr.msk.f32.mxu0 %vm368_vm6, %v1644_v55 }
 0x2b3   :  { %1949 = vmatprep.subr.bf16.mxu0 %v1940_v53 }
 0x2b5   :  { %1815 = vmatmul.mubr.msk.f32.vlgmr.msra.gmra.mrb[6].mxu0 %vm368_vm6, %v1645_v56 }
 0x2b6   :  { %1951 = vmatpush3.bf16.msra.mxu0 %v1940_v53  ;;  %1821 = vmatprep.mubr.msk.f32.mxu0 %vm368_vm6, %v1649_v57 }
 0x2b7   :  { %1833 = vmatprep.subr.msk.mxu0 %vm276_vm2, %v753_v36 }
 0x2b9   :  { %1822 = vmatmul.mubr.msk.f32.vlgmr.msra.gmra.mrb[8].mxu0 %vm368_vm6, %v1650_v58 }
 0x2ba   :  { %1834 = vmatpush3.msk.msra.mxu0 %vm276_vm2, %v753_v36 }
 0x2bb   :  { %1838 = vmatprep.subr.msk.mxu0 %vm276_vm2, %v946_v37 }
 0x384   :  { %v1809_v1 = vpop.f32.mrb[4].mxu0 }
 0x385   :  { %v456_v3 = vmul.f32 %v1809_v1, %v1643_v0  ;;  %v441_v4 = vpop.f32.mrb[5].mxu0 }
 0x386   :  { %v455_v6 = vmul.f32 %v1643_v0, %v441_v4 }
 0x387   :  { %v458_v8 = vadd.f32 %v456_v3, %v365_v2 }
 0x388   :  { %v457_v9 = vadd.f32 %v455_v6, %v364_v5  ;;  %v1816_v10 = vpop.f32.mrb[6].mxu0 }
 0x389   :  { %v549_v11 = vmul.f32 %v1816_v10, %v1648_v7  ;;  %v534_v12 = vpop.f32.mrb[7].mxu0 }
 0x38a   :  { %v548_v13 = vmul.f32 %v1648_v7, %v534_v12 }
 0x38b   :  { %v551_v15 = vadd.f32 %v549_v11, %v458_v8  ;;  %v1355_v8 = vmul.f32 0.5, %v2253_v51  ;;  %v1354_v11 = vmul.f32 0.5, %v2255_v52 }
 0x38c   :  { %v550_v16 = vadd.f32 %v548_v13, %v457_v9  ;;  %v1823_v17 = vpop.f32.mrb[8].mxu0 }
 0x38d   :  { %v642_v18 = vmul.f32 %v1823_v17, %v1653_v14  ;;  %v627_v19 = vpop.f32.mrb[9].mxu0 }
 0x38e   :  { %v641_v21 = vmul.f32 %v1653_v14, %v627_v19 }
 0x38f   :  { %v644_v22 = vadd.f32 %v642_v18, %v551_v15 }
 0x390   :  { %v643_v23 = vadd.f32 %v641_v21, %v550_v16 }
 0x391   :  { %v653_v24 = vadd.f32 %v1654_v20, %v644_v22 }
 0x392   :  { %v652_v25 = vadd.f32 %v1654_v20, %v643_v23 }
 0x393   :  { %v655_v26 = vmul.f32 0.5, %v653_v24 }
 0x394   :  { %v654_v27 = vmul.f32 0.5, %v652_v25 }
 0x395   :  { %2002 = vtanh.f32 %v655_v26 }
 0x396   :  { %2004 = vtanh.f32 %v654_v27 }
 0x39f   :  { %v2003_v28 = vpop.eup %2002 }
 0x3a0   :  { %v2005_v29 = vpop.eup %2004  ;;  %v659_v30 = vmul.f32 0.5, %v2003_v28 }
 0x3a1   :  { %v658_v31 = vmul.f32 0.5, %v2005_v29 }
 0x3a2   :  { %v661_v32 = vadd.f32 0.5, %v659_v30 }
 0x3a3   :  { %v660_v33 = vadd.f32 0.5, %v658_v31  ;;  %v1252_v31 = vld [vmem:[%s2506_s14] sm:$0xff] }
 0x3a4   :  { %v2307_v35 = vmul.f32 %v661_v32, %v653_v24  ;;  %v1253_v32 = vld [vmem:[%s2506_s14 + $0x8] sm:$0xff] }
 0x3a5   :  { %v2305_v34 = vmul.f32 %v660_v33, %v652_v25  ;;  %v1254_v33 = vld [vmem:[%s2506_s14 + $0x10] sm:$0xff]  ;;  %v1956_v36 = vpack.c.bf16 %v1253_v32, %v1252_v31 }
 0x3a7   :  { %1830 = vmatprep.mubr.msk.f32.mxu1 %vm667_vm7, %v2305_v34  ;;  %1957 = vmatprep.subr.bf16.mxu1 %v1956_v36 }
 0x3a8   :  { %1831 = vmatmul.mubr.msk.f32.vlgmr.msra.gmra.mrb[2].mxu1 %vm667_vm7, %v2307_v35 }
 0x3a9   :  { %1959 = vmatpush3.bf16.msra.mxu1 %v1956_v36 }
 0x47b   :  { %v1832_v38 = vpop.f32.mrb[2].mxu1 }
 0x47c   :  { %750 = vst.msk [vmem:[#allocation3 + $0x8] sm:$0xff] %vm269_vm5, %v1832_v38  ;;  %v740_v39 = vpop.f32.mrb[3].mxu1  ;;  %v1257_v38 = vld [vmem:[%s2506_s14 + $0x28] sm:$0xff] }
 0x47d   :  { %749 = vst.msk [vmem:[#allocation3] sm:$0xff] %vm269_vm5, %v740_v39 }
 0x483   :  { %v752_v42 = vld [vmem:[#allocation3 + $0x8] sm:$0xff] }
 0x484   :  { %v751_v41 = vld [vmem:[#allocation3] sm:$0xff] }
 0x485   :  { %1038 = vrot.lane.b32.xlu1 %v751_v41, %s2047_s29  ;;  %947 = vrot.lane.b32.xlu0 %v751_v41, %s2048_s10 }
 0x486   :  { %1835 = vmatprep.mubr.msk.f32.mxu0 %vm761_vm8, %v751_v41  ;;  %v1258_v41 = vld [vmem:[%s2506_s14 + $0x30] sm:$0xff] }
 0x487   :  { %1836 = vmatmul.mubr.msk.f32.vlgmr.msra.gmra.mrb[10].mxu0 %vm761_vm8, %v752_v42 }
 0x488   :  { %1839 = vmatpush3.msk.msra.mxu0 %vm276_vm2, %v946_v37  ;;  %v1256_v37 = vld [vmem:[%s2506_s14 + $0x20] sm:$0xff] }
 0x489   :  { %1040 = vrot.lane.b32.xlu1 %v752_v42, %s2047_s29  ;;  %949 = vrot.lane.b32.xlu0 %v752_v42, %s2048_s10  ;;  %v1964_v39 = vpack.c.bf16 %v1257_v38, %v1256_v37  ;;  %v1259_v42 = vld [vmem:[%s2506_s14 + $0x38] sm:$0xff] }
 0x48a   :  { %1843 = vmatprep.subr.msk.mxu0 %vm276_vm2, %v1037_v43 }
 0x4f7   :  { %v948_v44 = vpop.permute.xlu0 %947  ;;  %v1039_v45 = vpop.permute.xlu1 %1038 }
 0x4f8   :  { %1840 = vmatprep.mubr.msk.f32.mxu0 %vm761_vm8, %v948_v44  ;;  %v1260_v44 = vld [vmem:[%s2506_s14 + $0x40] sm:$0xff] }
 0x4fb   :  { %v950_v46 = vpop.permute.xlu0 %949  ;;  %v1041_v47 = vpop.permute.xlu1 %1040 }
 0x4fc   :  { %1841 = vmatmul.mubr.msk.f32.vlgmr.msra.gmra.mrb[12].mxu0 %vm761_vm8, %v950_v46 }
 0x4fd   :  { %1845 = vmatprep.mubr.msk.f32.mxu0 %vm761_vm8, %v1039_v45  ;;  %1844 = vmatpush3.msk.msra.mxu0 %vm276_vm2, %v1037_v43  ;;  %v1968_v43 = vpack.c.bf16 %v1259_v42, %v1258_v41  ;;  %v1261_v45 = vld [vmem:[%s2506_s14 + $0x48] sm:$0xff] }
 0x4fe   :  { %v1972_v46 = vpack.c.bf16 %v1261_v45, %v1260_v44 }
 0x500   :  { %1846 = vmatmul.mubr.msk.f32.vlgmr.msra.gmra.mrb[14].mxu0 %vm761_vm8, %v1041_v47  ;;  %v1262_v47 = vld [vmem:[%s2506_s14 + $0x50] sm:$0xff] }
 0x55a   :  { %v1837_v49 = vpop.f32.mrb[10].mxu0 }
 0x55b   :  { %v843_v50 = vadd.f32 %v1837_v49, %v1657_v48  ;;  %v837_v53 = vpop.f32.mrb[11].mxu0 }
 0x55c   :  { %v838_v54 = vadd.f32 %v1657_v48, %v837_v53  ;;  %v1263_v48 = vld [vmem:[%s2506_s14 + $0x58] sm:$0xff] }
 0x55d   :  { %v849_v55 = vand.u32 2147483647, %v843_v50  ;;  %v847_v20 = vmax.f32 %v843_v50, 0.0  ;;  %v1976_v49 = vpack.c.bf16 %v1263_v48, %v1262_v47 }
 0x55e   :  { %v848_v56 = vand.u32 2147483647, %v838_v54  ;;  %v846_v7 = vmax.f32 %v838_v54, 0.0 }
 0x55f   :  { %v851_v57 = vsub.f32 0.0, %v849_v55 }
 0x560   :  { %v850_v58 = vsub.f32 0.0, %v848_v56 }
 0x561   :  { %v854_v59 = vmul.f32 1.442695, %v851_v57 }
 0x562   :  { %v852_v60 = vmul.f32 1.442695, %v850_v58 }
 0x564   :  { %2006 = vpow2.f32 %v852_v60 }
 0x565   :  { %2008 = vpow2.f32 %v854_v59  ;;  %v1661_v59 = vld [vmem:[%s2504_s12] ss:$0 sm:$0xff] }
 0x56e   :  { %v2007_v61 = vpop.eup %2006 }
 0x56f   :  { %v856_v62 = vadd.f32 1.0, %v2007_v61  ;;  %v2009_v63 = vpop.eup %2008  ;;  %v859_v1 = vmul.f32 -0.5, %v2007_v61  ;;  %v862_v3 = vand.u32 2147483647, %v2007_v61 }
 0x570   :  { %v865_v0 = vadd.f32 1.0, %v2009_v63  ;;  %v868_v9 = vmul.f32 -0.5, %v2009_v63  ;;  %v871_v15 = vand.u32 2147483647, %v2009_v63 }
 0x571   :  { %2010 = vlog2.f32 %v856_v62  ;;  %v860_v2 = vadd.f32 1.0, %v859_v1  ;;  %vm863_vm9 = vcmp.lt.f32.partialorder %v862_v3, 0.0004427343 }
 0x572   :  { %2012 = vlog2.f32 %v865_v0  ;;  %v869_v14 = vadd.f32 1.0, %v868_v9  ;;  %vm872_vm10 = vcmp.lt.f32.partialorder %v871_v15, 0.0004427343 }
 0x573   :  { %v861_v6 = vmul.f32 %v2007_v61, %v860_v2  ;;  %2014 = vtanh.f32 %v1355_v8 }
 0x574   :  { %2016 = vtanh.f32 %v1354_v11  ;;  %v870_v18 = vmul.f32 %v2009_v63, %v869_v14 }
 0x57b   :  { %v2011_v4 = vpop.eup %2010 }
 0x57c   :  { %v858_v5 = vmul.f32 0.6931472, %v2011_v4  ;;  %v2013_v13 = vpop.eup %2012 }
 0x57d   :  { %v867_v17 = vmul.f32 0.6931472, %v2013_v13  ;;  %v2015_v21 = vpop.eup %2014 }
 0x57e   :  { %v864_v10 = vsel %vm863_vm9, %v861_v6, %v858_v5  ;;  %v2017_v23 = vpop.eup %2016  ;;  %v1359_v26 = vmul.f32 0.5, %v2015_v21 }
 0x57f   :  { %v2341_v12 = vadd.f32 %v864_v10, %v846_v7  ;;  %v873_v19 = vsel %vm872_vm10, %v870_v18, %v867_v17  ;;  %v1358_v25 = vmul.f32 0.5, %v2017_v23 }
 0x580   :  { %v2355_v22 = vadd.f32 %v873_v19, %v847_v20  ;;  %v1361_v28 = vadd.f32 0.5, %v1359_v26 }
 0x581   :  { %884 = vrot.lane.b32.xlu1 %v2341_v12, %s2049_s11  ;;  %878 = vrot.lane.b32.xlu0 %v2341_v12, %s2050_s21  ;;  %v2348_v16 = vmul.f32 %v2341_v12, %v2305_v34  ;;  %v1360_v27 = vadd.f32 0.5, %v1358_v25 }
 0x582   :  { %v2362_v24 = vmul.f32 %v2355_v22, %v2307_v35  ;;  %v1363_v30 = vmul.f32 %v1361_v28, %v2253_v51  ;;  %v1255_v51 = vld [vmem:[%s2506_s14 + $0x18] sm:$0xff] }
 0x583   :  { %v1362_v29 = vmul.f32 %v1360_v27, %v2255_v52  ;;  %v1960_v52 = vpack.c.bf16 %v1255_v51, %v1254_v33 }
 0x585   :  { %890 = vrot.lane.b32.xlu0 %v2341_v12, %s2051_s2  ;;  %907 = vrot.lane.b32.xlu1 %v2348_v16, %s2050_s21 }
 0x586   :  { %1961 = vmatprep.subr.bf16.mxu1 %v1960_v52 }
 0x587   :  { %1963 = vmatpush3.bf16.msra.mxu1 %v1960_v52 }
 0x588   :  { %1965 = vmatprep.subr.bf16.mxu1 %v1964_v39 }
 0x589   :  { %913 = vrot.lane.b32.xlu0 %v2348_v16, %s2049_s11  ;;  %919 = vrot.lane.b32.xlu1 %v2348_v16, %s2051_s2 }
 0x58b   :  { %1967 = vmatpush3.bf16.msra.mxu1 %v1964_v39 }
 0x58c   :  { %1969 = vmatprep.subr.bf16.mxu1 %v1968_v43 }
 0x58d   :  { %880 = vrot.lane.b32.xlu0 %v2355_v22, %s2050_s21  ;;  %886 = vrot.lane.b32.xlu1 %v2355_v22, %s2049_s11 }
 0x58f   :  { %1971 = vmatpush3.bf16.msra.mxu1 %v1968_v43 }
 0x590   :  { %1973 = vmatprep.subr.bf16.mxu1 %v1972_v46 }
 0x591   :  { %892 = vrot.lane.b32.xlu0 %v2355_v22, %s2051_s2  ;;  %909 = vrot.lane.b32.xlu1 %v2362_v24, %s2050_s21 }
 0x593   :  { %1975 = vmatpush3.bf16.msra.mxu1 %v1972_v46 }
 0x594   :  { %1977 = vmatprep.subr.bf16.mxu1 %v1976_v49 }
 0x595   :  { %915 = vrot.lane.b32.xlu0 %v2362_v24, %s2049_s11  ;;  %921 = vrot.lane.b32.xlu1 %v2362_v24, %s2051_s2 }
 0x597   :  { %1979 = vmatpush3.bf16.msra.mxu1 %v1976_v49 }
 0x599   :  { %1366 = vrot.lane.b32.xlu0 %v1362_v29, %s2052_s23  ;;  %1368 = vrot.lane.b32.xlu1 %v1363_v30, %s2052_s23 }
 0x5cf   :  { %v1842_v50 = vpop.f32.mrb[12].mxu0 }
 0x5d0   :  { %v1024_v53 = vpop.f32.mrb[13].mxu0 }
 0x5d3   :  { %v2407_v54 = vpop.f32.mrb[14].mxu0 }
 0x5d4   :  { %v2409_v55 = vpop.f32.mrb[15].mxu0 }
 0x5f3   :  { %v885_v56 = vpop.permute.xlu1 %884  ;;  %v879_v57 = vpop.permute.xlu0 %878 }
 0x5f4   :  { %v896_v58 = vsel %vm667_vm7, %v2341_v12, %v879_v57 }
 0x5f5   :  { %v898_v60 = vsel %vm80_vm0, %v896_v58, %v885_v56 }
 0x5f7   :  { %v891_v61 = vpop.permute.xlu0 %890  ;;  %v908_v62 = vpop.permute.xlu1 %907 }
 0x5f8   :  { %v901_v63 = vsel %vm900_vm11, %v898_v60, %v891_v61  ;;  %v925_v2 = vsel %vm667_vm7, %v2348_v16, %v908_v62 }
 0x5f9   :  { %v938_v0 = vmul.f32 %v1661_v59, %v901_v63 }
 0x5fb   :  { %v940_v1 = vmul.f32 1.442695, %v938_v0  ;;  %v914_v3 = vpop.permute.xlu0 %913  ;;  %v920_v4 = vpop.permute.xlu1 %919 }
 0x5fc   :  { %v927_v5 = vsel %vm80_vm0, %v925_v2, %v914_v3 }
 0x5fd   :  { %2018 = vpow2.f32 %v940_v1  ;;  %v929_v6 = vsel %vm900_vm11, %v927_v5, %v920_v4 }
 0x5fe   :  { %v1033_v7 = vmul.f32 %v1024_v53, %v929_v6 }
 0x5ff   :  { %v881_v8 = vpop.permute.xlu0 %880  ;;  %v887_v9 = vpop.permute.xlu1 %886 }
 0x600   :  { %1035 = vst.msk [vmem:[#allocation5] sm:$0xff] %vm183_vm1, %v1033_v7  ;;  %v897_v10 = vsel %vm667_vm7, %v2355_v22, %v881_v8 }
 0x601   :  { %v899_v11 = vsel %vm80_vm0, %v897_v10, %v887_v9 }
 0x603   :  { %v893_v12 = vpop.permute.xlu0 %892  ;;  %v910_v13 = vpop.permute.xlu1 %909 }
 0x604   :  { %v902_v14 = vsel %vm900_vm11, %v899_v11, %v893_v12  ;;  %v926_v18 = vsel %vm667_vm7, %v2362_v24, %v910_v13 }
 0x605   :  { %v939_v15 = vmul.f32 %v1661_v59, %v902_v14 }
 0x607   :  { %v2019_v16 = vpop.eup %2018  ;;  %v942_v17 = vmul.f32 1.442695, %v939_v15  ;;  %v916_v19 = vpop.permute.xlu0 %915  ;;  %v1126_v27 = vld [vmem:[#allocation5] sm:$0x1]  ;;  %v1130_v31 = vld [vmem:[#allocation5 + $0x1] sm:$0x1] }
 0x608   :  { %v922_v20 = vpop.permute.xlu1 %921  ;;  %944 = vst.msk [vmem:[#allocation4] sm:$0xff] %vm183_vm1, %v2019_v16  ;;  %v928_v21 = vsel %vm80_vm0, %v926_v18, %v916_v19  ;;  %v1134_v51 = vld [vmem:[#allocation5 + $0x2] sm:$0x1]  ;;  %v1138_v39 = vld [vmem:[#allocation5 + $0x3] sm:$0x1]  ;;  %vm1239_vm0 = vcmask 1045504  }
 0x609   :  { %2020 = vpow2.f32 %v942_v17  ;;  %v930_v22 = vsel %vm900_vm11, %v928_v21, %v922_v20  ;;  %v1142_v44 = vld [vmem:[#allocation5 + $0x4] sm:$0x1]  ;;  %v1146_v48 = vld [vmem:[#allocation5 + $0x5] sm:$0x1]  ;;  %v1150_v57 = vld [vmem:[#allocation5 + $0x6] sm:$0x1] }
 0x60a   :  { %v1034_v23 = vmul.f32 %v1842_v50, %v930_v22  ;;  %v1154_v2 = vld [vmem:[#allocation5 + $0x7] sm:$0x1] }
 0x60c   :  { %1036 = vst.msk [vmem:[#allocation5 + $0x8] sm:$0xff] %vm183_vm1, %v1034_v23 }
 0x60f   :  { %v1124_v25 = vld [vmem:[#allocation4] sm:$0x1]  ;;  %v1128_v30 = vld [vmem:[#allocation4 + $0x1] sm:$0x1]  ;;  %v1132_v33 = vld [vmem:[#allocation4 + $0x2] sm:$0x1] }
 0x610   :  { %v1125_v26 = vmul.f32 0.0, %v1124_v25  ;;  %v1136_v37 = vld [vmem:[#allocation4 + $0x3] sm:$0x1]  ;;  %v1140_v42 = vld [vmem:[#allocation4 + $0x4] sm:$0x1] }
 0x611   :  { %v1144_v46 = vld [vmem:[#allocation4 + $0x5] sm:$0x1]  ;;  %v1148_v50 = vld [vmem:[#allocation4 + $0x6] sm:$0x1]  ;;  %v1152_v61 = vld [vmem:[#allocation4 + $0x7] sm:$0x1] }
 0x612   :  { %v1127_v28 = vadd.f32 %v1126_v27, %v1125_v26 }
 0x613   :  { %v2021_v29 = vpop.eup %2020  ;;  %v1158_v12 = vld [vmem:[#allocation5 + $0x8] sm:$0x1]  ;;  %v1162_v19 = vld [vmem:[#allocation5 + $0x9] sm:$0x1]  ;;  %v1166_v23 = vld [vmem:[#allocation5 + $0xa] sm:$0x1] }
 0x614   :  { %945 = vst.msk [vmem:[#allocation4 + $0x8] sm:$0xff] %vm183_vm1, %v2021_v29  ;;  %v1129_v24 = vmul.f32 %v1128_v30, %v1127_v28 }
 0x616   :  { %v1131_v32 = vadd.f32 %v1130_v31, %v1129_v24  ;;  %v1174_v31 = vld [vmem:[#allocation5 + $0xc] sm:$0x1] }
 0x618   :  { %v1133_v36 = vmul.f32 %v1132_v33, %v1131_v32  ;;  %v1189_v56 = vrot.slane %v1131_v32, 7 }
 0x61a   :  { %v1135_v52 = vadd.f32 %v1134_v51, %v1133_v36  ;;  %v1231_v1 = vsel %vm1230_vm12, %v1127_v28, %v1189_v56  ;;  %v1170_v28 = vld [vmem:[#allocation5 + $0xb] sm:$0x1] }
 0x61b   :  { %v1156_v7 = vld [vmem:[#allocation4 + $0x8] sm:$0x1]  ;;  %v1160_v16 = vld [vmem:[#allocation4 + $0x9] sm:$0x1]  ;;  %v1164_v21 = vld [vmem:[#allocation4 + $0xa] sm:$0x1] }
 0x61c   :  { %v1137_v38 = vmul.f32 %v1136_v37, %v1135_v52  ;;  %v1192_v58 = vrot.slane %v1135_v52, 6  ;;  %v1168_v26 = vld [vmem:[#allocation4 + $0xb] sm:$0x1]  ;;  %v1172_v30 = vld [vmem:[#allocation4 + $0xc] sm:$0x1] }
 0x61d   :  { %v1176_v33 = vld [vmem:[#allocation4 + $0xd] sm:$0x1]  ;;  %v1180_v52 = vld [vmem:[#allocation4 + $0xe] sm:$0x1] }
 0x61e   :  { %v1139_v41 = vadd.f32 %v1138_v39, %v1137_v38  ;;  %v1233_v4 = vsel %vm1232_vm13, %v1231_v1, %v1192_v58  ;;  %v1182_v39 = vld [vmem:[#allocation5 + $0xe] sm:$0x1]  ;;  %v1375_v1 = vld [vmem:[%s2508_s16 + $0x8] sm:$0xff] }
 0x620   :  { %v1141_v43 = vmul.f32 %v1140_v42, %v1139_v41  ;;  %v1195_v60 = vrot.slane %v1139_v41, 5 }
 0x622   :  { %v1143_v45 = vadd.f32 %v1142_v44, %v1141_v43  ;;  %v1235_v6 = vsel %vm1234_vm14, %v1233_v4, %v1195_v60  ;;  %v1184_v44 = vld [vmem:[#allocation4 + $0xf] sm:$0x1] }
 0x624   :  { %v1145_v47 = vmul.f32 %v1144_v46, %v1143_v45  ;;  %v1198_v62 = vrot.slane %v1143_v45, 4 }
 0x626   :  { %v1147_v49 = vadd.f32 %v1146_v48, %v1145_v47  ;;  %v1236_v8 = vsel %vm276_vm2, %v1235_v6, %v1198_v62 }
 0x628   :  { %v1149_v53 = vmul.f32 %v1148_v50, %v1147_v49  ;;  %v1201_v0 = vrot.slane %v1147_v49, 3  ;;  %v1186_v49 = vld [vmem:[#allocation5 + $0xf] sm:$0x1] }
 0x62a   :  { %v1151_v59 = vadd.f32 %v1150_v57, %v1149_v53  ;;  %v1238_v11 = vsel %vm1237_vm15, %v1236_v8, %v1201_v0  ;;  %v1374_v0 = vld [vmem:[%s2508_s16] sm:$0xff] }
 0x62c   :  { %v1153_v63 = vmul.f32 %v1152_v61, %v1151_v59  ;;  %v1204_v3 = vrot.slane %v1151_v59, 2 }
 0x62e   :  { %v1155_v5 = vadd.f32 %v1154_v2, %v1153_v63  ;;  %v1240_v13 = vsel %vm1239_vm0, %v1238_v11, %v1204_v3  ;;  %v1980_v2 = vpack.c.bf16 %v1375_v1, %v1374_v0  ;;  %v1376_v3 = vld [vmem:[%s2508_s16 + $0x10] sm:$0xff]  ;;  %v1369_v11 = vpop.permute.xlu1 %1368 }
 0x630   :  { %v1157_v9 = vmul.f32 %v1156_v7, %v1155_v5  ;;  %v1207_v10 = vrot.slane %v1155_v5, 1  ;;  %1981 = vmatprep.subr.bf16.mxu0 %v1980_v2 }
 0x631   :  { %1983 = vmatpush3.bf16.msra.mxu0 %v1980_v2 }
 0x632   :  { %v1159_v14 = vadd.f32 %v1158_v12, %v1157_v9  ;;  %v1242_v15 = vsel %vm1241_vm3, %v1240_v13, %v1207_v10  ;;  %1879 = vmatprep.subr.mxu0 %v1376_v3  ;;  %v1367_v10 = vpop.permute.xlu0 %1366 }
 0x633   :  { %v1250_v17 = vmul.f32 %v1242_v15, %v2409_v55  ;;  %v1178_v55 = vld [vmem:[#allocation5 + $0xd] sm:$0x1]  ;;  %v2055_v15 = vmov 0.0  }
 0x634   :  { %v1161_v18 = vmul.f32 %v1160_v16, %v1159_v14 }
 0x635   :  { %1872 = vmatprep.mubr.msk.f32.mxu1 %vm183_vm1, %v1250_v17  ;;  %1880 = vmatpush3.msra.mxu0 %v1376_v3 }
 0x636   :  { %v1163_v20 = vadd.f32 %v1162_v19, %v1161_v18  ;;  %v1536_v18 = vld [vmem:[%s2509_s17] sm:$0xff]  ;;  %v1537_v19 = vld [vmem:[%s2509_s17 + $0x8] sm:$0xf]  ;;  %s2022_s17 = scalar_lea.vmem %s1624_s26, 16 }
 0x637   :  { %p2023_p0 = scmp.ne.s32.totalorder %s1624_s26, %s2022_s17  ;;  %p2028_p2 = scmp.lt.s32.totalorder %s2026_s7, %s2022_s17 }
 0x638   :  { %v1165_v22 = vmul.f32 %v1164_v21, %v1163_v20  ;;  %v1210_v37 = vrot.slane %v1163_v20, 7 }
 0x639   :  { %p2029_p3 = por %p2028_p2, %p2027_p1 }
 0x63a   :  { %v1167_v25 = vadd.f32 %v1166_v23, %v1165_v22  ;;  %v1243_v46 = vsel %vm1230_vm12, %v1159_v14, %v1210_v37  ;;  %v2053_v14 = vmov 0.0|0.0   ;;  %v1988_v22 = vpack.c.bf16 %v1537_v19, %v1536_v18 }
 0x63b   :  { %1984 = vmatprep.subr.bf16.mxu0 %v2053_v14  ;;  %p2030_p4 = pnand %p2029_p3, %p2023_p0 }
 0x63c   :  { %v1169_v27 = vmul.f32 %v1168_v26, %v1167_v25  ;;  %v1213_v41 = vrot.slane %v1167_v25, 6  ;;  %v1538_v26 = vld [vmem:[#allocation6] sm:$0x1] }
 0x63e   :  { %v1171_v29 = vadd.f32 %v1170_v28, %v1169_v27  ;;  %v1244_v53 = vsel %vm1232_vm13, %v1243_v46, %v1213_v41 }
 0x640   :  { %v1173_v24 = vmul.f32 %v1172_v30, %v1171_v29  ;;  %v1216_v43 = vrot.slane %v1171_v29, 5 }
 0x642   :  { %v1175_v32 = vadd.f32 %v1174_v31, %v1173_v24  ;;  %v1245_v57 = vsel %vm1234_vm14, %v1244_v53, %v1216_v43 }
 0x644   :  { %v1177_v36 = vmul.f32 %v1176_v33, %v1175_v32  ;;  %v1219_v45 = vrot.slane %v1175_v32, 4 }
 0x646   :  { %v1179_v51 = vadd.f32 %v1178_v55, %v1177_v36  ;;  %v1246_v58 = vsel %vm276_vm2, %v1245_v57, %v1219_v45 }
 0x648   :  { %v1181_v38 = vmul.f32 %v1180_v52, %v1179_v51  ;;  %v1222_v48 = vrot.slane %v1179_v51, 3 }
 0x64a   :  { %v1183_v42 = vadd.f32 %v1182_v39, %v1181_v38  ;;  %v1247_v60 = vsel %vm1237_vm15, %v1246_v58, %v1222_v48 }
 0x64c   :  { %v1185_v47 = vmul.f32 %v1184_v44, %v1183_v42  ;;  %v1225_v50 = vrot.slane %v1183_v42, 2 }
 0x64e   :  { %v1187_v56 = vadd.f32 %v1186_v49, %v1185_v47  ;;  %v1248_v61 = vsel %vm1239_vm0, %v1247_v60, %v1225_v50 }
 0x650   :  { %v1228_v59 = vrot.slane %v1187_v56, 1 }
 0x652   :  { %v1249_v62 = vsel %vm1241_vm3, %v1248_v61, %v1228_v59 }
 0x653   :  { %v1251_v63 = vmul.f32 %v2407_v54, %v1249_v62  ;;  %v1668_v54 = vld [vmem:[%s2507_s15] ss:$0 sm:$0xff] }
 0x654   :  { %v1272_v4 = vmul.f32 %v1668_v54, %v2307_v35  ;;  %v1271_v6 = vmul.f32 %v1668_v54, %v2305_v34  ;;  %v1458_v35 = vlaneseq }
 0x655   :  { %1873 = vmatmul.mubr.msk.f32.vlgmr.msra.gmra.mrb[4].mxu1 %vm183_vm1, %v1251_v63  ;;  %vm2054_vm1 = vmmov 0  }
 0x656   :  { %v1459_v16 = vand.u32 127, %v1458_v35 }
 0x658   :  { %vm1460_vm2 = vcmp.eq.s32.totalorder %v1459_v16, 15 }
 0x659   :  { %v1673_v21 = vsel %vm1460_vm2, 1.0, %v2055_v15 }
 0x728   :  { %v1874_v5 = vpop.f32.mrb[4].mxu1 }
 0x729   :  { %v1351_v7 = vadd.f32 %v1874_v5, %v1272_v4  ;;  %v1345_v8 = vpop.f32.mrb[5].mxu1 }
 0x72a   :  { %v1346_v9 = vadd.f32 %v1345_v8, %v1271_v6 }
 0x72b   :  { %v1373_v13 = vmul.f32 %v1369_v11, %v1351_v7 }
 0x72c   :  { %v1372_v12 = vmul.f32 %v1367_v10, %v1346_v9 }
 0x72e   :  { %1881 = vmatprep.mubr.msk.f32.mxu0 %vm667_vm7, %v1372_v12 }
 0x72f   :  { %1882 = vmatmul.mubr.msk.f32.vlgmr.msra.gmra.mrb[16].mxu0 %vm667_vm7, %v1373_v13  ;;  %vm1615_vm7 = vcmask 0  }
 0x730   :  { %1888 = vmatprep.mubr.msk.f32.mxu0 %vm2054_vm1, %v2055_v15 }
 0x802   :  { %v1883_v34 = vpop.f32.mrb[16].mxu0 }
 0x803   :  { %v1449_v17 = vpop.f32.mrb[17].mxu0 }
 0x804   :  { %v1985_v20 = vpack.c.bf16 %v1883_v34, %v1449_v17 }
 0x806   :  { %1986 = vmatpush3.bf16.msra.mxu0 %v1985_v20 }
 0x807   :  { %1987 = vmatprep.subr.bf16.mxu0 %v2053_v14 }
 0x809   :  { %1889 = vmatmul.mubr.msk.f32.vlgmr.msra.gmra.mrb[18].mxu0 %vm368_vm6, %v1673_v21 }
 0x80a   :  { %1990 = vmatpush3.bf16.msk.msra.mxu0 %vm2234_vm4, %v1988_v22  ;;  %1895 = vmatprep.mubr.msk.f32.mxu0 %vm2054_vm1, %v2055_v15 }
 0x8dc   :  { %v1532_v23 = vpop.f32.mrb[18].mxu0 }
 0x8dd   :  { %v1890_v25 = vpop.f32.mrb[19].mxu0  ;;  %1896 = vmatmul.mubr.msk.f32.vlgmr.msra.gmra.mrb[20].mxu0 %vm269_vm5, %v1532_v23 }
 0x9b0   :  { %v1611_v27 = vpop.f32.mrb[20].mxu0 }
 0x9b1   :  { %v1612_v28 = vadd.f32 %v1611_v27, %v1538_v26  ;;  %v1897_v29 = vpop.f32.mrb[21].mxu0 }
 0x9b3   :  { %1616 = vst.msk [vmem:[#allocation7] sm:$0x1] %vm1615_vm7, %v1612_v28 }
 0x9b4   :  { %2033 = shalt.err (!%p2030_p4)
}
 0x9b5   :  { %s2034_s28 = scalar_lea.hbm %s2511_s19, 16 }
 0x9b6   :  { %p2035_p5 = scmp.ne.s32.totalorder %s2511_s19, %s2034_s28  ;;  %p2038_p6 = scmp.lt.u32.totalorder %s2034_s28, %s2511_s19 }
 0x9b8   :  { %p2040_p7 = pnand %p2038_p6, %p2035_p5 }
 0x9ba   :  { %2043 = shalt.err (!%p2040_p7)
}
 0x9bb   :  { %1626 = dma.vmem_to_hbm [thread:$0]  %s1624_s26, 16, %s2511_s19, [#allocation8]  }
 0x9bc   :  { %2044 = dma.done.wait [#allocation8], 16  }
 0x9bd   :  { %2045 = vsyncadd [#allocation8], 4294967280 }
 0x9be   :  { %1630 = vsyncpa [#allocation8], 1 }

</bundles_post_ra>
